<compile_context>
chip_gen: v5e
topology: v5e:2x2
jax: 0.10.0
libtpu: 0.0.40
codegen_flags: <defaults>
</compile_context>

<pallas_src>
import math

import jax
import jax.numpy as jnp
from jax.experimental import pallas as pl
from jax.experimental.pallas import tpu as pltpu

_LANE = 128
_SUBLANE = 8


def _round_up(x, m):
    return ((x + m - 1) // m) * m


def _location_net_kernel(params_ref, ht_ref, w1_ref, b1_ref, w2_ref, b2_ref,
                         eps_ref, lt_ref, logp_ref):
    std = params_ref[0]
    neg_log_norm_total = params_ref[1]  # -L * (log(std) + 0.5*log(2*pi))

    # fc: Linear(In -> H, zero-padded to lane-dense H_pad) + ReLU.
    h = jnp.dot(ht_ref[...], w1_ref[...], preferred_element_type=jnp.float32)
    h = jnp.maximum(h + b1_ref[...], 0.0)

    # fl: Linear(H_pad -> L) + tanh => mu (padded w2 rows are zero => exact).
    mu = jnp.dot(h, w2_ref[...], preferred_element_type=jnp.float32)
    mu = jnp.tanh(mu + b2_ref[...])

    # Reparameterized Normal(mu, std) sample; clamp AFTER log_prob, exactly as
    # the PyTorch module does.
    eps = eps_ref[...]
    lt_ref[...] = jnp.clip(mu + std * eps, -1.0, 1.0)

    # log_prob of the UNCLAMPED sample depends only on eps:
    #   sum_j log N(lt_raw_j | mu_j, std) = -0.5*sum_j eps_j^2 - L*(log std + 0.5*log 2pi)
    logp_ref[...] = (-0.5 * jnp.sum(eps * eps, axis=1, keepdims=True)
                     + neg_log_norm_total)


def _choose_batch_tile(B, block_b):
    """Batch tile: multiple of 8; keep >= 2 grid steps when the batch allows it
    so the 'parallel' axis can use both TensorCores on v7x (one extra ~0.35us
    grid step is negligible on 1-TC chips)."""
    if B >= 2 * _SUBLANE:
        tm = min(block_b, _round_up(-(-B // 2), _SUBLANE))
    else:
        tm = _round_up(max(B, 1), _SUBLANE)
    return max(tm, _SUBLANE)


def location_network_forward(ht, w1, b1, w2, b2, eps, std, *, block_b=1024):
    """ht:(B,In)  w1:(In,H)  b1:(H,)  w2:(H,L)  b2:(L,)  eps:(B,L)  std: scalar.

    Returns lt:(B,L), loc_p:(B,).
    """
    B, In = ht.shape
    H = w1.shape[1]
    L = w2.shape[1]

    tm = _choose_batch_tile(B, block_b)
    grid = (pl.cdiv(B, tm),)

    # Zero-pad the hidden dim to a lane-dense width (weights are tiny, so this
    # per-call padding is negligible next to the batch streams).
    H_pad = _round_up(H, _LANE)
    w1_p = jnp.zeros((In, H_pad), jnp.float32).at[:, :H].set(w1)
    b1_p = jnp.zeros((1, H_pad), jnp.float32).at[0, :H].set(b1)
    w2_p = jnp.zeros((H_pad, L), jnp.float32).at[:H, :].set(w2)
    b2_2d = b2.reshape(1, L).astype(jnp.float32)

    std_f = jnp.asarray(std, jnp.float32)
    params = jnp.stack(
        [std_f, -(jnp.log(std_f) + 0.5 * math.log(2.0 * math.pi)) * L])

    lt, logp = pl.pallas_call(
        _location_net_kernel,
        out_shape=(jax.ShapeDtypeStruct((B, L), jnp.float32),
                   jax.ShapeDtypeStruct((B, 1), jnp.float32)),
        grid=grid,
        in_specs=[
            pl.BlockSpec(memory_space=pltpu.MemorySpace.SMEM),  # [std, -L*norm]
            pl.BlockSpec((tm, In), lambda i: (i, 0)),           # ht tile
            pl.BlockSpec((In, H_pad), lambda i: (0, 0)),        # w1 (resident)
            pl.BlockSpec((1, H_pad), lambda i: (0, 0)),         # b1 (resident)
            pl.BlockSpec((H_pad, L), lambda i: (0, 0)),         # w2 (resident)
            pl.BlockSpec((1, L), lambda i: (0, 0)),             # b2 (resident)
            pl.BlockSpec((tm, L), lambda i: (i, 0)),            # eps tile
        ],
        out_specs=(
            pl.BlockSpec((tm, L), lambda i: (i, 0)),            # lt
            pl.BlockSpec((tm, 1), lambda i: (i, 0)),            # loc_p
        ),
        compiler_params=pltpu.CompilerParams(
            dimension_semantics=("parallel",)),
    )(params, ht.astype(jnp.float32), w1_p, b1_p, w2_p, b2_2d,
      eps.astype(jnp.float32))

    return lt, logp.reshape(B)


if __name__ == "__main__":
    # Small shapes consistent with the module.
    batch = 8
    input_size = 32
    hidden_size = input_size // 2          # 16
    location_size = 2
    std = 0.17

    key = jax.random.PRNGKey(0)
    k_ht, k_w1, k_b1, k_w2, k_b2, k_eps, k_ht2, k_eps2 = jax.random.split(key, 8)

    # Deterministic parameter init (synthetic; shapes match the nn.Linear layers,
    # stored as (in_features, out_features) so the kernel computes x @ W + b).
    lim1 = 1.0 / math.sqrt(input_size)
    lim2 = 1.0 / math.sqrt(hidden_size)
    w1 = jax.random.uniform(k_w1, (input_size, hidden_size), jnp.float32, -lim1, lim1)
    b1 = jax.random.uniform(k_b1, (hidden_size,), jnp.float32, -lim1, lim1)
    w2 = jax.random.uniform(k_w2, (hidden_size, location_size), jnp.float32, -lim2, lim2)
    b2 = jax.random.uniform(k_b2, (location_size,), jnp.float32, -lim2, lim2)

    def reference(ht, eps):
        feat = jnp.maximum(ht @ w1 + b1, 0.0)
        mu = jnp.tanh(feat @ w2 + b2)
        lt_raw = mu + std * eps                      # Normal(mu, std).sample()
        logp = (-0.5 * ((lt_raw - mu) / std) ** 2
                - math.log(std) - 0.5 * math.log(2.0 * math.pi)).sum(axis=1)
        return jnp.clip(lt_raw, -1.0, 1.0), logp

    # Case 1: tiny batch (single grid step).  Case 2: batch that exercises the
    # >=2-step parallel grid and the trailing partial block (200 % 104 != 0).
    for bsz, k_h, k_e in [(batch, k_ht, k_eps), (200, k_ht2, k_eps2)]:
        ht = jax.random.normal(k_h, (bsz, input_size), dtype=jnp.float32)
        eps = jax.random.normal(k_e, (bsz, location_size), dtype=jnp.float32)

        lt, loc_p = location_network_forward(ht, w1, b1, w2, b2, eps, std)
        jax.block_until_ready((lt, loc_p))

        lt_ref, logp_ref = reference(ht, eps)
        assert lt.shape == (bsz, location_size), lt.shape
        assert loc_p.shape == (bsz,), loc_p.shape
        assert jnp.allclose(lt, lt_ref, atol=1e-5), "lt mismatch"
        assert jnp.allclose(loc_p, logp_ref, atol=1e-5), "loc_p mismatch"

    print("KERNEL_OK")
</pallas_src>

<mosaic_0001>
module attributes {stable_mosaic.version = 11 : i64} {
  func.func @_location_net_kernel(%arg0: i32, %arg1: memref<2xf32, #tpu.memory_space<smem>>, %arg2: memref<8x32xf32, #tpu.memory_space<vmem>>, %arg3: memref<32x128xf32, #tpu.memory_space<vmem>>, %arg4: memref<1x128xf32, #tpu.memory_space<vmem>>, %arg5: memref<128x2xf32, #tpu.memory_space<vmem>>, %arg6: memref<1x2xf32, #tpu.memory_space<vmem>>, %arg7: memref<8x2xf32, #tpu.memory_space<vmem>>, %arg8: memref<8x2xf32, #tpu.memory_space<vmem>>, %arg9: memref<8x1xf32, #tpu.memory_space<vmem>>) attributes {dimension_semantics = [#tpu.dimension_semantics<parallel>], iteration_bounds = array<i64: 1>, scalar_prefetch = 0 : i64, scratch_operands = 0 : i64, tpu.core_type = #tpu.core_type<tc>, window_params = [{transform_indices = @transform_0, window_bounds = array<i64: 2>}, {transform_indices = @transform_1, window_bounds = array<i64: 8, 32>}, {pipeline_mode = #tpu.pipeline_mode<synchronous>, transform_indices = @transform_2, window_bounds = array<i64: 32, 128>}, {pipeline_mode = #tpu.pipeline_mode<synchronous>, transform_indices = @transform_3, window_bounds = array<i64: 1, 128>}, {pipeline_mode = #tpu.pipeline_mode<synchronous>, transform_indices = @transform_4, window_bounds = array<i64: 128, 2>}, {pipeline_mode = #tpu.pipeline_mode<synchronous>, transform_indices = @transform_5, window_bounds = array<i64: 1, 2>}, {transform_indices = @transform_6, window_bounds = array<i64: 8, 2>}, {transform_indices = @transform_7, window_bounds = array<i64: 8, 2>}, {transform_indices = @transform_8, window_bounds = array<i64: 8, 1>}]} {
    %c0 = arith.constant 0 : index
    %0 = memref.load %arg1[%c0] : memref<2xf32, #tpu.memory_space<smem>>
    %c1 = arith.constant 1 : index
    %1 = memref.load %arg1[%c1] : memref<2xf32, #tpu.memory_space<smem>>
    %c0_0 = arith.constant 0 : index
    %c0_1 = arith.constant 0 : index
    %2 = vector.load %arg2[%c0_0, %c0_1] : memref<8x32xf32, #tpu.memory_space<vmem>>, vector<8x32xf32>
    %c0_2 = arith.constant 0 : index
    %c0_3 = arith.constant 0 : index
    %3 = vector.load %arg3[%c0_2, %c0_3] : memref<32x128xf32, #tpu.memory_space<vmem>>, vector<32x128xf32>
    %cst = arith.constant dense<0.000000e+00> : vector<8x128xf32>
    %4 = tpu.matmul %2, %3, %cst {dimension_numbers = #tpu.dot_dimension_numbers<[1], [0], [0], [1], [0, 0, 1, 1], [], []>} : vector<8x32xf32>, vector<32x128xf32>, vector<8x128xf32> -> vector<8x128xf32>
    %c0_4 = arith.constant 0 : index
    %c0_5 = arith.constant 0 : index
    %5 = vector.load %arg4[%c0_4, %c0_5] : memref<1x128xf32, #tpu.memory_space<vmem>>, vector<1x128xf32>
    %6 = vector.broadcast %5 : vector<1x128xf32> to vector<8x128xf32>
    %7 = arith.addf %4, %6 : vector<8x128xf32>
    %cst_6 = arith.constant 0.000000e+00 : f32
    %8 = vector.broadcast %cst_6 : f32 to vector<8x128xf32>
    %9 = arith.maximumf %7, %8 : vector<8x128xf32>
    %c0_7 = arith.constant 0 : index
    %c0_8 = arith.constant 0 : index
    %10 = vector.load %arg5[%c0_7, %c0_8] : memref<128x2xf32, #tpu.memory_space<vmem>>, vector<128x2xf32>
    %cst_9 = arith.constant dense<0.000000e+00> : vector<8x2xf32>
    %11 = tpu.matmul %9, %10, %cst_9 {dimension_numbers = #tpu.dot_dimension_numbers<[1], [0], [0], [1], [0, 0, 1, 1], [], []>} : vector<8x128xf32>, vector<128x2xf32>, vector<8x2xf32> -> vector<8x2xf32>
    %c0_10 = arith.constant 0 : index
    %c0_11 = arith.constant 0 : index
    %12 = vector.load %arg6[%c0_10, %c0_11] : memref<1x2xf32, #tpu.memory_space<vmem>>, vector<1x2xf32>
    %13 = vector.broadcast %12 : vector<1x2xf32> to vector<8x2xf32>
    %14 = arith.addf %11, %13 : vector<8x2xf32>
    %15 = math.tanh %14 : vector<8x2xf32>
    %c0_12 = arith.constant 0 : index
    %c0_13 = arith.constant 0 : index
    %16 = vector.load %arg7[%c0_12, %c0_13] : memref<8x2xf32, #tpu.memory_space<vmem>>, vector<8x2xf32>
    %17 = vector.broadcast %0 : f32 to vector<8x2xf32>
    %18 = arith.mulf %17, %16 : vector<8x2xf32>
    %19 = arith.addf %15, %18 : vector<8x2xf32>
    %cst_14 = arith.constant -1.000000e+00 : f32
    %cst_15 = arith.constant 1.000000e+00 : f32
    %20 = vector.broadcast %cst_14 : f32 to vector<8x2xf32>
    %21 = arith.maximumf %20, %19 : vector<8x2xf32>
    %22 = vector.broadcast %cst_15 : f32 to vector<8x2xf32>
    %23 = arith.minimumf %22, %21 : vector<8x2xf32>
    %c0_16 = arith.constant 0 : index
    %c0_17 = arith.constant 0 : index
    %24 = vector.load %arg8[%c0_16, %c0_17] : memref<8x2xf32, #tpu.memory_space<vmem>>, vector<8x2xf32>
    tpu.vector_store %arg8[%c0_16, %c0_17], %23 {strides = array<i32>} : memref<8x2xf32, #tpu.memory_space<vmem>>, vector<8x2xf32>,
    %25 = arith.mulf %16, %16 : vector<8x2xf32>
    %cst_18 = arith.constant dense<0.000000e+00> : vector<8xf32>
    %26 = vector.multi_reduction <add>, %25, %cst_18 [1] : vector<8x2xf32> to vector<8xf32>
    %27 = vector.shape_cast %26 : vector<8xf32> to vector<8x1xf32>
    %cst_19 = arith.constant -5.000000e-01 : f32
    %28 = vector.broadcast %cst_19 : f32 to vector<8x1xf32>
    %29 = arith.mulf %28, %27 : vector<8x1xf32>
    %30 = vector.broadcast %1 : f32 to vector<8x1xf32>
    %31 = arith.addf %29, %30 : vector<8x1xf32>
    %c0_20 = arith.constant 0 : index
    %c0_21 = arith.constant 0 : index
    %32 = vector.load %arg9[%c0_20, %c0_21] : memref<8x1xf32, #tpu.memory_space<vmem>>, vector<8x1xf32>
    tpu.vector_store %arg9[%c0_20, %c0_21], %31 {strides = array<i32>} : memref<8x1xf32, #tpu.memory_space<vmem>>, vector<8x1xf32>,
    return
  }
  func.func @transform_0(%arg0: i32) -> i32 {
    %c0_i32 = arith.constant 0 : i32
    %c0_i32_0 = arith.constant 0 : i32
    return %c0_i32 : i32
  }
  func.func @transform_1(%arg0: i32) -> (i32, i32) {
    %c0_i32 = arith.constant 0 : i32
    %c0_i32_0 = arith.constant 0 : i32
    return %arg0, %c0_i32 : i32, i32
  }
  func.func @transform_2(%arg0: i32) -> (i32, i32) {
    %c0_i32 = arith.constant 0 : i32
    %c0_i32_0 = arith.constant 0 : i32
    %c0_i32_1 = arith.constant 0 : i32
    return %c0_i32, %c0_i32_0 : i32, i32
  }
  func.func @transform_3(%arg0: i32) -> (i32, i32) {
    %c0_i32 = arith.constant 0 : i32
    %c0_i32_0 = arith.constant 0 : i32
    %c0_i32_1 = arith.constant 0 : i32
    return %c0_i32, %c0_i32_0 : i32, i32
  }
  func.func @transform_4(%arg0: i32) -> (i32, i32) {
    %c0_i32 = arith.constant 0 : i32
    %c0_i32_0 = arith.constant 0 : i32
    %c0_i32_1 = arith.constant 0 : i32
    return %c0_i32, %c0_i32_0 : i32, i32
  }
  func.func @transform_5(%arg0: i32) -> (i32, i32) {
    %c0_i32 = arith.constant 0 : i32
    %c0_i32_0 = arith.constant 0 : i32
    %c0_i32_1 = arith.constant 0 : i32
    return %c0_i32, %c0_i32_0 : i32, i32
  }
  func.func @transform_6(%arg0: i32) -> (i32, i32) {
    %c0_i32 = arith.constant 0 : i32
    %c0_i32_0 = arith.constant 0 : i32
    return %arg0, %c0_i32 : i32, i32
  }
  func.func @transform_7(%arg0: i32) -> (i32, i32) {
    %c0_i32 = arith.constant 0 : i32
    %c0_i32_0 = arith.constant 0 : i32
    return %arg0, %c0_i32 : i32, i32
  }
  func.func @transform_8(%arg0: i32) -> (i32, i32) {
    %c0_i32 = arith.constant 0 : i32
    %c0_i32_0 = arith.constant 0 : i32
    return %arg0, %c0_i32 : i32, i32
  }
}

</mosaic_0001>

<bundles_post_ra>
// kernel: tpu_custom_call.1
= control target key start
LH: loop header
LB: loop body
LE: loop exit
PB: predicated region body
PF: predicated region fallthrough
CT: control target
= control target key end

     0   :  { %14 = vsyncpa [#allocation3], 0  ;;  %s166_s30 = smov [#allocation2]   ;;  %s295_s0 = inlined_call_operand.vmem [shape: f32[2], index: 0, kind: input, shape index: {}]   ;;  %s296_s1 = inlined_call_operand.vmem [shape: f32[8,32], index: 1, kind: input, shape index: {}]   ;;  %s297_s2 = inlined_call_operand.vmem [shape: f32[32,128], index: 2, kind: input, shape index: {}]   ;;  %s298_s3 = inlined_call_operand.vmem [shape: f32[1,128], index: 3, kind: input, shape index: {}]   ;;  %s299_s4 = inlined_call_operand.vmem [shape: f32[128,2], index: 4, kind: input, shape index: {}]   ;;  %s300_s5 = inlined_call_operand.vmem [shape: f32[1,2], index: 5, kind: input, shape index: {}]   ;;  %s301_s6 = inlined_call_operand.vmem [shape: f32[8,2], index: 6, kind: input, shape index: {}]   ;;  %s302_s7 = inlined_call_operand.vmem [shape: f32[8,2], index: 7, kind: output, shape index: {0}]   ;;  %s303_s8 = inlined_call_operand.vmem [shape: f32[8,1], index: 8, kind: output, shape index: {1}]  }
   0x1   :  { %s20_s29 = sshll.u32 %s295_s0, 4  ;;  %s21_s29 = int_to_ptr.vmem [resolvable:$true] %s20_s29 }
   0x2   :  { %23 = dma.vmem_to_smem %s21_s29, 16, %s166_s30, [#allocation3]  }
   0x3   :  { %164 = dma.done.wait [#allocation3], 16  }
   0x4   :  { %165 = vsyncadd [#allocation3], 4294967280 }
   0x5   :  { %40 = sfence }
   0x6   :  { %v47_v0 = vld [vmem:[%s297_s2 + $0x18] sm:$0xff]  ;;  %v46_v1 = vld [vmem:[%s297_s2 + $0x10] sm:$0xff]  ;;  %v45_v3 = vld [vmem:[%s297_s2 + $0x8] sm:$0xff]  ;;  %vm52_vm0 = vcmask 261120   ;;  %vm124_vm1 = vcmask 15360   ;;  %s144_s28 = sld [smem:[#allocation2 + $0x1]] }
   0x7   :  { %68 = vmatpush.msra.mxu0 %v47_v0  ;;  %v92_v2 = vld [vmem:[%s299_s4 + $0x78] sm:$0xff]  ;;  %v91_v4 = vld [vmem:[%s299_s4 + $0x70] sm:$0xff]  ;;  %v90_v5 = vld [vmem:[%s299_s4 + $0x68] sm:$0xff]  ;;  %vm133_vm2 = vcmask 7168   ;;  %s41_s29 = sld [smem:[#allocation2]] }
   0x8   :  { %97 = vmatpush.msra.mxu1 %v92_v2  ;;  %v44_v6 = vld [vmem:[%s297_s2] sm:$0xff]  ;;  %v88_v9 = vld [vmem:[%s299_s4 + $0x58] sm:$0xff]  ;;  %v87_v10 = vld [vmem:[%s299_s4 + $0x50] sm:$0xff] }
   0x9   :  { %69 = vmatpush.msra.mxu0 %v46_v1  ;;  %v43_v7 = vld [vmem:[%s296_s1] sm:$0xff]  ;;  %v86_v11 = vld [vmem:[%s299_s4 + $0x48] sm:$0xff]  ;;  %v84_v13 = vld [vmem:[%s299_s4 + $0x38] sm:$0xff] }
   0xa   :  { %98 = vmatpush.msra.mxu1 %v91_v4  ;;  %v89_v8 = vld [vmem:[%s299_s4 + $0x60] sm:$0xff]  ;;  %v83_v14 = vld [vmem:[%s299_s4 + $0x30] sm:$0xff]  ;;  %v82_v15 = vld [vmem:[%s299_s4 + $0x28] sm:$0xff] }
   0xb   :  { %70 = vmatpush.msra.mxu0 %v45_v3  ;;  %v85_v12 = vld [vmem:[%s299_s4 + $0x40] sm:$0xff]  ;;  %v80_v17 = vld [vmem:[%s299_s4 + $0x18] sm:$0xff]  ;;  %v79_v18 = vld [vmem:[%s299_s4 + $0x10] sm:$0xff] }
   0xc   :  { %99 = vmatpush.msra.mxu1 %v90_v5  ;;  %v81_v16 = vld [vmem:[%s299_s4 + $0x20] sm:$0xff]  ;;  %v78_v19 = vld [vmem:[%s299_s4 + $0x8] sm:$0xff]  ;;  %v131_v30 = vstv %s144_s28 }
   0xd   :  { %71 = vmatpush.msra.mxu0 %v44_v6  ;;  %v77_v20 = vld [vmem:[%s299_s4] sm:$0xff]  ;;  %v119_v35 = vstv %s41_s29 }
   0xe   :  { %145 = vmatmul.msk.f32.vlgmr.msra.gmra.mxu0 %vm52_vm0, %v43_v7  ;;  %100 = vmatpush.msra.mxu1 %v89_v8  ;;  %v118_v21 = vld [vmem:[%s301_s6] sm:$0xff] }
   0xf   :  { %v126_v22 = vmul.f32 %v118_v21, %v118_v21  ;;  %v148_v24 = vld [vmem:[%s298_s3] ss:$0 sm:$0xff]  ;;  %v120_v36 = vmul.f32 %v119_v35, %v118_v21 }
  0x10   :  { %101 = vmatpush.msra.mxu1 %v88_v9  ;;  %v149_v32 = vld [vmem:[%s300_s5] ss:$0 sm:$0xff] }
  0x11   :  { %v127_v23 = vsel %vm124_vm1, %v126_v22, 0.0 }
  0x12   :  { %102 = vmatpush.msra.mxu1 %v87_v10  ;;  %128 = vadd.xlane.f32.xlu0 %v127_v23 }
  0x14   :  { %103 = vmatpush.msra.mxu1 %v86_v11 }
  0x16   :  { %104 = vmatpush.msra.mxu1 %v85_v12 }
  0x18   :  { %105 = vmatpush.msra.mxu1 %v84_v13 }
  0x1a   :  { %106 = vmatpush.msra.mxu1 %v83_v14 }
  0x1c   :  { %107 = vmatpush.msra.mxu1 %v82_v15 }
  0x1e   :  { %108 = vmatpush.msra.mxu1 %v81_v16 }
  0x20   :  { %109 = vmatpush.msra.mxu1 %v80_v17 }
  0x22   :  { %110 = vmatpush.msra.mxu1 %v79_v18 }
  0x24   :  { %111 = vmatpush.msra.mxu1 %v78_v19 }
  0x26   :  { %112 = vmatpush.msra.mxu1 %v77_v20 }
  0x85   :  { %v129_v28 = vpop.xlane.xlu0 %128 }
  0x86   :  { %v130_v29 = vmul.f32 -0.5, %v129_v28 }
  0x88   :  { %v132_v31 = vadd.f32 %v131_v30, %v130_v29 }
  0x8a   :  { %134 = vst.msk [vmem:[%s303_s8] sm:$0xff] %vm133_vm2, %v132_v31 }
  0x8b   :  { %v73_v25 = vpop.f32.mrf.mxu0 }
  0x8c   :  { %v74_v26 = vadd.f32 %v148_v24, %v73_v25 }
  0x8e   :  { %v76_v27 = vmax.f32 %v74_v26, 0.0 }
  0x90   :  { %113 = vmatmul.f32.vlgmr.msra.gmra.mxu1 %v76_v27 }
 0x10d   :  { %v114_v33 = vpop.f32.mrf.mxu1 }
 0x10e   :  { %v115_v34 = vadd.f32 %v149_v32, %v114_v33 }
 0x110   :  { %150 = vtanh.f32 %v115_v34 }
 0x116   :  { %v151_v37 = vpop.eup %150 }
 0x117   :  { %v121_v38 = vadd.f32 %v151_v37, %v120_v36 }
 0x119   :  { %v146_v39 = vclamps-f32 %v121_v38, 1.0 }
 0x11b   :  { %125 = vst.msk [vmem:[%s302_s7] sm:$0xff] %vm124_vm1, %v146_v39 }
 0x11c   :  { %143 = vsyncpa [#allocation3], 1 }

</bundles_post_ra>
